<compile_context>
chip_gen: v7x
topology: tpu7x:2x2x1
jax: 0.10.0
libtpu: 0.0.40
codegen_flags: <defaults>
</compile_context>

<pallas_src>
import math

import jax
import jax.numpy as jnp
from jax.experimental import pallas as pl
from jax.experimental.pallas import tpu as pltpu

ALIGN_BYTES = 512                 # GradBucket.get_aligned_size alignment (2**9)
LANES = 1024                      # trailing lane dim (multiple of 128 -> unmasked vst)
SUBLANES = 8                      # sublane granularity
TARGET_STEP_BYTES = 4 << 20       # ~4 MiB per grid step for the (W, rows, LANES) block
VMEM_LIMIT_BYTES = 32 << 20       # fits v5e/v6e (128 MiB) and v7x (64 MiB physical)


def _cdiv(a: int, b: int) -> int:
    return -(-a // b)


def aligned_numel(numel: int, element_size: int = 4) -> int:
    """GradBucket.get_aligned_size: (bytes + 511) & ~511, in elements."""
    nbytes = numel * element_size
    aligned = (nbytes + ALIGN_BYTES - 1) & ~(ALIGN_BYTES - 1)
    assert aligned % element_size == 0
    return aligned // element_size


def _slab_geometry(numel: int, world_size: int):
    """Pad a flat length to a dense (rows, LANES) slab; pick a row tile so the
    per-grid-step (world_size, tile_rows, LANES) f32 block is ~TARGET_STEP_BYTES."""
    per_row_bytes = world_size * LANES * 4
    tile_rows = max(SUBLANES,
                    (TARGET_STEP_BYTES // per_row_bytes) // SUBLANES * SUBLANES)
    rows = _cdiv(numel, LANES)
    if rows <= tile_rows:
        rows = max(SUBLANES, _cdiv(rows, SUBLANES) * SUBLANES)
        tile_rows = rows                       # single dense step
    else:
        rows = _cdiv(rows, tile_rows) * tile_rows
    return rows, tile_rows


# ----------------------------- Pallas kernels ------------------------------ #

def _allreduce_avg_kernel(g_ref, o_ref):
    # g_ref: (W, tile_rows, LANES) dense per-rank slabs; o_ref: (tile_rows, LANES).
    # Reduce over the leading world axis = W-1 full-vreg VALU adds (no XLU).
    w = g_ref.shape[0]
    o_ref[...] = jnp.sum(g_ref[...], axis=0) * (1.0 / w)


def bucket_allreduce_avg(bucket3d: jax.Array, tile_rows: int) -> jax.Array:
    """dist.all_reduce(bucket.data, op=ReduceOp.AVG) over the simulated DP world axis.

    bucket3d: (world_size, rows, LANES) float32, rows % tile_rows == 0.
    Returns the reduced (rows, LANES) slab.
    """
    w, rows, lanes = bucket3d.shape
    assert rows % tile_rows == 0
    return pl.pallas_call(
        _allreduce_avg_kernel,
        out_shape=jax.ShapeDtypeStruct((rows, lanes), bucket3d.dtype),
        grid_spec=pltpu.PrefetchScalarGridSpec(
            num_scalar_prefetch=0,
            grid=(rows // tile_rows,),
            in_specs=[pl.BlockSpec((w, tile_rows, lanes), lambda i: (0, i, 0))],
            out_specs=pl.BlockSpec((tile_rows, lanes), lambda i: (i, 0)),
        ),
        compiler_params=pltpu.CompilerParams(
            dimension_semantics=("parallel",),
            vmem_limit_bytes=VMEM_LIMIT_BYTES,
        ),
    )(bucket3d)


def _broadcast_kernel(p_ref, o_ref):
    # p_ref: (tile_rows, LANES)  ->  o_ref: (W, tile_rows, LANES); dense per-rank
    # (8k, 128m) store slabs (full-vreg, unmasked vst).
    o_ref[...] = jnp.broadcast_to(p_ref[...][None], o_ref.shape)


def broadcast_slab(slab2d: jax.Array, world_size: int, tile_rows: int) -> jax.Array:
    """dist.broadcast(params, dp_rank0): replicate the rank-0 packed param slab
    to all ranks. slab2d: (rows, LANES) -> (world_size, rows, LANES)."""
    rows, lanes = slab2d.shape
    assert rows % tile_rows == 0
    return pl.pallas_call(
        _broadcast_kernel,
        out_shape=jax.ShapeDtypeStruct((world_size, rows, lanes), slab2d.dtype),
        grid_spec=pltpu.PrefetchScalarGridSpec(
            num_scalar_prefetch=0,
            grid=(rows // tile_rows,),
            in_specs=[pl.BlockSpec((tile_rows, lanes), lambda i: (i, 0))],
            out_specs=pl.BlockSpec((world_size, tile_rows, lanes),
                                   lambda i: (0, i, 0)),
        ),
        compiler_params=pltpu.CompilerParams(
            dimension_semantics=("parallel",),
            vmem_limit_bytes=VMEM_LIMIT_BYTES,
        ),
    )(slab2d)


# ------------------------------ layout glue -------------------------------- #

def _pack_params_slab(params: dict, order, rows: int) -> jax.Array:
    """Pack rank-0 params at 512-byte-aligned offsets via one concat (no zero-init
    + serial dynamic-update-slice chain)."""
    parts = []
    for name in order:
        flat = jnp.ravel(params[name].astype(jnp.float32))
        parts.append(jnp.pad(flat, (0, aligned_numel(flat.size) - flat.size)))
    slab = jnp.concatenate(parts)
    slab = jnp.pad(slab, (0, rows * LANES - slab.size))
    return slab.reshape(rows, LANES)


def _pack_grads_bucket(grads: dict, order, world_size: int, rows: int) -> jax.Array:
    """GradBucket.push for every rank at once: (W, rows, LANES) float32 slab."""
    parts = []
    for name in order:
        g = grads[name].astype(jnp.float32).reshape(world_size, -1)
        parts.append(jnp.pad(g, ((0, 0), (0, aligned_numel(g.shape[1]) - g.shape[1]))))
    slab = jnp.concatenate(parts, axis=1)
    slab = jnp.pad(slab, ((0, 0), (0, rows * LANES - slab.shape[1])))
    return slab.reshape(world_size, rows, LANES)


# ------------------------------ NaiveDDP wrapper ---------------------------- #

class NaiveDDPJax:
    def __init__(self, module_params: dict, world_size: int,
                 bucket_cap_bytes: int = 4 << 20, reduce_op: str = "avg",
                 module_fn=None):
        self.world_size = world_size
        self.element_size = 4  # float32
        self.module_fn = module_fn
        # Faithful to the spec bug: `reduce_op.lower == 'sum'` compares a bound method
        # to a string, so the reduce op is ALWAYS AVG regardless of `reduce_op`.
        self.reduce_op = "avg"

        # GradBucket layout: 512-byte-aligned offsets, in parameter order.
        self.offsets, self.shapes = {}, {}
        off = 0
        for name, p in module_params.items():
            self.offsets[name] = off
            self.shapes[name] = tuple(p.shape)
            off += aligned_numel(int(jnp.size(p)), self.element_size)
        self._packed_numel = off

        # Bucket sized to the (multi-MiB) cap, grown to fit if params exceed it.
        cap_numel = max(bucket_cap_bytes // self.element_size, self._packed_numel)
        self._bucket_rows, self._bucket_tile_rows = _slab_geometry(cap_numel,
                                                                   world_size)

        # broadcast_params(): one fused Pallas call over a single packed slab.
        prows, ptile = _slab_geometry(self._packed_numel, world_size)
        slab = _pack_params_slab(module_params, self.offsets, prows)
        bcast = broadcast_slab(slab, world_size, ptile)            # (W, rows, LANES)
        flat = bcast.reshape(world_size, -1)
        self.params = {}
        for name, shape in self.shapes.items():
            o = self.offsets[name]
            n = math.prod(shape)
            self.params[name] = flat[:, o:o + n].reshape((world_size,) + shape)

        # JIT the pack -> all-reduce-avg -> unpack pipeline so XLA fuses the glue.
        offsets, shapes = dict(self.offsets), dict(self.shapes)
        rows, tile_rows, w = self._bucket_rows, self._bucket_tile_rows, world_size

        def _reduce(per_rank_grads):
            bucket = _pack_grads_bucket(per_rank_grads, offsets, w, rows)
            reduced = bucket_allreduce_avg(bucket, tile_rows)      # Pallas hot path
            rflat = reduced.reshape(-1)
            out = {}
            for name, shape in shapes.items():
                o = offsets[name]
                n = math.prod(shape)
                out[name] = rflat[o:o + n].reshape(shape)
            return out

        self._reduce_fn = jax.jit(_reduce)

    def forward(self, *inputs, **kwargs):
        # TODO(synk): NaiveDDP.forward delegates to the wrapped torch module; the DDP
        # wrapper adds no forward compute, so without a wrapped module this is identity.
        if self.module_fn is not None:
            return self.module_fn(*inputs, **kwargs)
        return inputs[0] if len(inputs) == 1 else inputs

    __call__ = forward

    def reduce_gradients(self, per_rank_grads: dict) -> dict:
        """GradBucket.push for all ranks + dist.all_reduce(bucket.data, op=AVG)."""
        return self._reduce_fn(per_rank_grads)


# ---------------------------------- main ----------------------------------- #

if __name__ == "__main__":
    key = jax.random.PRNGKey(0)
    world_size = 4
    hidden, ffn = 32, 64

    # deterministic rank-0 parameters, as NaiveDDP.__init__ would receive
    k1, k2, k3, k4, k5 = jax.random.split(key, 5)
    module_params = {
        "expert0.w1": jax.random.normal(k1, (hidden, ffn), jnp.float32),
        "expert0.b1": jax.random.normal(k2, (ffn,), jnp.float32),
        "expert1.w1": jax.random.normal(k3, (hidden, ffn), jnp.float32),
        "expert1.b1": jax.random.normal(k4, (ffn,), jnp.float32),
    }

    ddp = NaiveDDPJax(module_params, world_size=world_size)

    # forward passthrough (wrapped module unspecified)
    x = jax.random.normal(k5, (2, 8, hidden), jnp.float32)
    y = ddp(x)
    jax.block_until_ready(y)
    assert y.shape == (2, 8, hidden)

    # broadcast correctness: every rank's copy equals rank-0's
    for name, p in module_params.items():
        bp = jax.block_until_ready(ddp.params[name])
        assert bp.shape == (world_size,) + p.shape
        assert bool(jnp.all(bp == p[None])), name

    # synthetic per-rank gradients; reduce_gradients == all-reduce AVG over ranks
    gkeys = jax.random.split(jax.random.PRNGKey(1), len(module_params))
    per_rank_grads = {
        name: jax.random.normal(gk, (world_size,) + p.shape, jnp.float32)
        for gk, (name, p) in zip(gkeys, module_params.items())
    }
    reduced = ddp.reduce_gradients(per_rank_grads)
    jax.block_until_ready(reduced)

    for name, g in per_rank_grads.items():
        ref = jnp.mean(g, axis=0)
        assert bool(jnp.allclose(reduced[name], ref, atol=1e-6, rtol=1e-6)), name

    print("KERNEL_OK")
</pallas_src>

<mosaic_0001>
module attributes {stable_mosaic.version = 11 : i64} {
  func.func @_broadcast_kernel(%arg0: i32, %arg1: memref<8x1024xf32, #tpu.memory_space<vmem>>, %arg2: memref<4x8x1024xf32, #tpu.memory_space<vmem>>) attributes {dimension_semantics = [#tpu.dimension_semantics<parallel>], iteration_bounds = array<i64: 1>, scalar_prefetch = 0 : i64, scratch_operands = 0 : i64, tpu.core_type = #tpu.core_type<tc>, window_params = [{transform_indices = @transform_0, window_bounds = array<i64: 8, 1024>}, {transform_indices = @transform_1, window_bounds = array<i64: 4, 8, 1024>}]} {
    %c0 = arith.constant 0 : index
    %c0_0 = arith.constant 0 : index
    %0 = vector.load %arg1[%c0, %c0_0] : memref<8x1024xf32, #tpu.memory_space<vmem>>, vector<8x1024xf32>
    %1 = vector.shape_cast %0 : vector<8x1024xf32> to vector<1x8x1024xf32>
    %2 = vector.shape_cast %1 : vector<1x8x1024xf32> to vector<1x8x1024xf32>
    %3 = vector.broadcast %2 : vector<1x8x1024xf32> to vector<4x8x1024xf32>
    %c0_1 = arith.constant 0 : index
    %c0_2 = arith.constant 0 : index
    %c0_3 = arith.constant 0 : index
    %4 = vector.load %arg2[%c0_1, %c0_2, %c0_3] : memref<4x8x1024xf32, #tpu.memory_space<vmem>>, vector<4x8x1024xf32>
    tpu.vector_store %arg2[%c0_1, %c0_2, %c0_3], %3 {strides = array<i32>} : memref<4x8x1024xf32, #tpu.memory_space<vmem>>, vector<4x8x1024xf32>,
    return
  }
  func.func @transform_0(%arg0: i32) -> (i32, i32) {
    %c0_i32 = arith.constant 0 : i32
    %c0_i32_0 = arith.constant 0 : i32
    return %arg0, %c0_i32 : i32, i32
  }
  func.func @transform_1(%arg0: i32) -> (i32, i32, i32) {
    %c0_i32 = arith.constant 0 : i32
    %c0_i32_0 = arith.constant 0 : i32
    %c0_i32_1 = arith.constant 0 : i32
    return %c0_i32, %arg0, %c0_i32_0 : i32, i32, i32
  }
}

</mosaic_0001>

<bundles_post_ra>
// kernel: tpu_custom_call.1
= control target key start
LH: loop header
LB: loop body
LE: loop exit
PB: predicated region body
PF: predicated region fallthrough
CT: control target
= control target key end

     0   :  { %6 = vsyncpa [#allocation3], 0  ;;  %s175_s0 = inlined_call_operand.hbm [shape: f32[8,1024], index: 0, kind: input, shape index: {}]   ;;  %s176_s1 = inlined_call_operand.hbm [shape: f32[4,8,1024], index: 1, kind: output, shape index: {}]  }
   0x1   :  { %7 = vsyncpa [#allocation4], 0  ;;  %s130_s6 = smov [#allocation2]   ;;  %s82_s10 = scalar_lea.hbm %s175_s0, 1024 }
   0x2   :  { %s14_s7 = sshll.u32 %s130_s6, 4  ;;  %p83_p0 = scmp.ne.s32.totalorder %s175_s0, %s82_s10  ;;  %s15_s7 = int_to_ptr.vmem [resolvable:$true] %s14_s7 }
   0x3   :  { %p86_p1 = scmp.lt.u32.totalorder %s82_s10, %s175_s0 }
   0x5   :  { %p88_p2 = pnand %p86_p1, %p83_p0 }
   0x7   :  { %91 = shalt.err (!%p88_p2)
}
   0x8   :  { %s92_s15 = scalar_lea.vmem %s15_s7, 1024  ;;  %p97_p4 = scmp.lt.s32.totalorder %s15_s7, %s15_s7 }
   0x9   :  { %p93_p3 = scmp.ne.s32.totalorder %s15_s7, %s92_s15  ;;  %p98_p5 = scmp.lt.s32.totalorder %s92_s15, %s92_s15 }
   0xb   :  { %p99_p6 = por %p98_p5, %p97_p4 }
   0xd   :  { %p100_p7 = pnand %p99_p6, %p93_p3 }
   0xf   :  { %103 = shalt.err (!%p100_p7)
}
  0x10   :  { %17 = dma.hbm_to_vmem [thread:$0]  %s175_s0, 1024, %s15_s7, [#allocation3]  }
  0x11   :  { %126 = dma.done.wait [#allocation3], 1024  }
  0x12   :  { %127 = vsyncadd [#allocation3], 4294966272  ;;  %s131_s18 = smov [#allocation5]   ;;  %v21_v0 = vld [vmem:[#allocation2] sm:$0xff]  ;;  %v22_v1 = vld [vmem:[#allocation2 + $0x8] sm:$0xff] }
  0x13   :  { %s66_s19 = sshll.u32 %s131_s18, 4  ;;  %v23_v2 = vld [vmem:[#allocation2 + $0x10] sm:$0xff]  ;;  %29 = vst [vmem:[#allocation5] sm:$0xff] %v21_v0  ;;  %37 = vst [vmem:[#allocation5 + $0x40] sm:$0xff] %v21_v0  ;;  %v24_v3 = vld [vmem:[#allocation2 + $0x18] sm:$0xff]  ;;  %s156_s19 = int_to_ptr.vmem [resolvable:$true] %s66_s19 }
  0x14   :  { %45 = vst [vmem:[#allocation5 + $0x80] sm:$0xff] %v21_v0  ;;  %53 = vst [vmem:[#allocation5 + $0xc0] sm:$0xff] %v21_v0  ;;  %v25_v4 = vld [vmem:[#allocation2 + $0x20] sm:$0xff]  ;;  %v26_v5 = vld [vmem:[#allocation2 + $0x28] sm:$0xff]  ;;  %s104_s0 = scalar_lea.vmem %s156_s19, 4096  ;;  %p109_p9 = scmp.lt.s32.totalorder %s156_s19, %s156_s19 }
  0x15   :  { %30 = vst [vmem:[#allocation5 + $0x8] sm:$0xff] %v22_v1  ;;  %38 = vst [vmem:[#allocation5 + $0x48] sm:$0xff] %v22_v1  ;;  %v27_v6 = vld [vmem:[#allocation2 + $0x30] sm:$0xff]  ;;  %v28_v7 = vld [vmem:[#allocation2 + $0x38] sm:$0xff]  ;;  %p105_p8 = scmp.ne.s32.totalorder %s156_s19, %s104_s0  ;;  %p110_p10 = scmp.lt.s32.totalorder %s104_s0, %s104_s0 }
  0x16   :  { %46 = vst [vmem:[#allocation5 + $0x88] sm:$0xff] %v22_v1  ;;  %54 = vst [vmem:[#allocation5 + $0xc8] sm:$0xff] %v22_v1 }
  0x17   :  { %31 = vst [vmem:[#allocation5 + $0x10] sm:$0xff] %v23_v2  ;;  %39 = vst [vmem:[#allocation5 + $0x50] sm:$0xff] %v23_v2  ;;  %p111_p11 = por %p110_p10, %p109_p9 }
  0x18   :  { %47 = vst [vmem:[#allocation5 + $0x90] sm:$0xff] %v23_v2  ;;  %55 = vst [vmem:[#allocation5 + $0xd0] sm:$0xff] %v23_v2 }
  0x19   :  { %32 = vst [vmem:[#allocation5 + $0x18] sm:$0xff] %v24_v3  ;;  %40 = vst [vmem:[#allocation5 + $0x58] sm:$0xff] %v24_v3  ;;  %p112_p12 = pnand %p111_p11, %p105_p8 }
  0x1a   :  { %48 = vst [vmem:[#allocation5 + $0x98] sm:$0xff] %v24_v3  ;;  %56 = vst [vmem:[#allocation5 + $0xd8] sm:$0xff] %v24_v3 }
  0x1b   :  { %33 = vst [vmem:[#allocation5 + $0x20] sm:$0xff] %v25_v4  ;;  %41 = vst [vmem:[#allocation5 + $0x60] sm:$0xff] %v25_v4 }
  0x1c   :  { %49 = vst [vmem:[#allocation5 + $0xa0] sm:$0xff] %v25_v4  ;;  %57 = vst [vmem:[#allocation5 + $0xe0] sm:$0xff] %v25_v4 }
  0x1d   :  { %34 = vst [vmem:[#allocation5 + $0x28] sm:$0xff] %v26_v5  ;;  %42 = vst [vmem:[#allocation5 + $0x68] sm:$0xff] %v26_v5 }
  0x1e   :  { %50 = vst [vmem:[#allocation5 + $0xa8] sm:$0xff] %v26_v5  ;;  %58 = vst [vmem:[#allocation5 + $0xe8] sm:$0xff] %v26_v5 }
  0x1f   :  { %35 = vst [vmem:[#allocation5 + $0x30] sm:$0xff] %v27_v6  ;;  %43 = vst [vmem:[#allocation5 + $0x70] sm:$0xff] %v27_v6 }
  0x20   :  { %51 = vst [vmem:[#allocation5 + $0xb0] sm:$0xff] %v27_v6  ;;  %59 = vst [vmem:[#allocation5 + $0xf0] sm:$0xff] %v27_v6 }
  0x21   :  { %36 = vst [vmem:[#allocation5 + $0x38] sm:$0xff] %v28_v7  ;;  %44 = vst [vmem:[#allocation5 + $0x78] sm:$0xff] %v28_v7 }
  0x22   :  { %52 = vst [vmem:[#allocation5 + $0xb8] sm:$0xff] %v28_v7  ;;  %60 = vst [vmem:[#allocation5 + $0xf8] sm:$0xff] %v28_v7 }
  0x23   :  { %115 = shalt.err (!%p112_p12)
}
  0x24   :  { %s116_s22 = scalar_lea.hbm %s176_s1, 4096 }
  0x25   :  { %p117_p13 = scmp.ne.s32.totalorder %s176_s1, %s116_s22  ;;  %p120_p0 = scmp.lt.u32.totalorder %s116_s22, %s176_s1 }
  0x27   :  { %p122_p1 = pnand %p120_p0, %p117_p13 }
  0x29   :  { %125 = shalt.err (!%p122_p1)
}
  0x2a   :  { %s132_s27 = smov 1024   ;;  %s133_s28 = smov 64  }
  0x2b   :  { %72 = dma.vmem_to_hbm [thread:$0]  %s156_s19, 4096, %s176_s1, [#allocation4], %s132_s27, %s132_s27, %s133_s28  }
  0x2c   :  { %128 = dma.done.wait [#allocation4], 4096  }
  0x2d   :  { %129 = vsyncadd [#allocation4], 4294963200 }
  0x2e   :  { %76 = vsyncpa [#allocation3], 1 }
  0x2f   :  { %77 = vsyncpa [#allocation4], 1 }

</bundles_post_ra>
